<compile_context>
chip_gen: v5e
topology: v5e:2x2
jax: 0.10.0
libtpu: 0.0.40
codegen_flags: <defaults>
</compile_context>

<pallas_src>
import jax
import jax.numpy as jnp
from jax import lax
from jax.experimental import pallas as pl
from jax.experimental.pallas import tpu as pltpu


def snakenet_kernel(x_ref, w1_ref, b1_ref, w2_ref, b2_ref, out_ref):
    # fc1: x [TB, I] contracted with w1 [H, I] along I -> [TB, H]  (x @ w1.T)
    h = lax.dot_general(
        x_ref[...], w1_ref[...],
        dimension_numbers=(((1,), (1,)), ((), ())),
        preferred_element_type=jnp.float32,
    )
    h = jnp.maximum(h + b1_ref[...], 0.0)          # bias + ReLU (f32 VPU path)

    # fc2: h [TB, H] contracted with w2_pad [O_pad, H] along H -> [TB, O_pad]
    o = lax.dot_general(
        h, w2_ref[...],
        dimension_numbers=(((1,), (1,)), ((), ())),
        preferred_element_type=jnp.float32,
    )
    # Lane-dense store: O_pad is a multiple of 128, so this is an unmasked vst.
    out_ref[...] = (o + b2_ref[...]).astype(out_ref.dtype)


def prepare_params(w1, b1, w2, b2):
    """One-time parameter prep (do this at model init, not per forward).

    Keeps PyTorch [out, in] weight layout (no transposes), reshapes biases to
    2-D tiles, and zero-pads fc2's output dim to a multiple of 128 so the
    kernel's output store is lane-dense.
    """
    H, _I = w1.shape
    O = w2.shape[0]
    O_pad = max(128, ((O + 127) // 128) * 128)

    b1_2d = b1.reshape(1, H)
    w2_pad = jnp.zeros((O_pad, H), dtype=w2.dtype).at[:O, :].set(w2)
    b2_pad = jnp.zeros((1, O_pad), dtype=b2.dtype).at[0, :O].set(b2)
    return w1, b1_2d, w2_pad, b2_pad, O


def _pick_batch_tile(B):
    # Full batch as one tile when small (block == full dim is always legal);
    # otherwise 512-row tiles (multiple of 8) and Pallas masks the remainder.
    return B if B <= 512 else 512


def snakenet_forward(x, params):
    """x: [B, I]; params from prepare_params (PyTorch Linear layout weights)."""
    w1, b1_2d, w2_pad, b2_pad, O = params
    B, I = x.shape
    H = w1.shape[0]
    O_pad = w2_pad.shape[0]

    TB = _pick_batch_tile(B)
    grid = (pl.cdiv(B, TB),)

    out_padded = pl.pallas_call(
        snakenet_kernel,
        out_shape=jax.ShapeDtypeStruct((B, O_pad), x.dtype),
        grid=grid,
        in_specs=[
            pl.BlockSpec((TB, I), lambda i: (i, 0)),        # x: streamed per batch tile
            pl.BlockSpec((H, I), lambda i: (0, 0)),         # w1: VMEM-resident
            pl.BlockSpec((1, H), lambda i: (0, 0)),         # b1: VMEM-resident
            pl.BlockSpec((O_pad, H), lambda i: (0, 0)),     # w2 (padded): resident
            pl.BlockSpec((1, O_pad), lambda i: (0, 0)),     # b2 (padded): resident
        ],
        out_specs=pl.BlockSpec((TB, O_pad), lambda i: (i, 0)),
        compiler_params=pltpu.CompilerParams(
            dimension_semantics=("parallel",),              # batch tiles -> both TCs on v7x
        ),
    )(x, w1, b1_2d, w2_pad, b2_pad)

    return out_padded[:, :O]


if __name__ == "__main__":
    # Small shapes implied by the module: flat state vector -> hidden -> action logits.
    batch, input_size, hidden_size, output_size = 8, 32, 64, 4

    key = jax.random.PRNGKey(0)
    kx, kw1, kb1, kw2, kb2 = jax.random.split(key, 5)

    x = jax.random.normal(kx, (batch, input_size), dtype=jnp.float32)
    # PyTorch Linear shapes: weights [out, in], biases [out].
    w1 = jax.random.normal(kw1, (hidden_size, input_size), dtype=jnp.float32) * 0.1
    b1 = jax.random.normal(kb1, (hidden_size,), dtype=jnp.float32) * 0.1
    w2 = jax.random.normal(kw2, (output_size, hidden_size), dtype=jnp.float32) * 0.1
    b2 = jax.random.normal(kb2, (output_size,), dtype=jnp.float32) * 0.1

    params = prepare_params(w1, b1, w2, b2)          # done once, like module init
    out = snakenet_forward(x, params)
    jax.block_until_ready(out)

    # Reference check in plain JAX (same math as the torch forward).
    ref = jnp.maximum(x @ w1.T + b1, 0.0) @ w2.T + b2
    assert out.shape == (batch, output_size)
    assert jnp.allclose(out, ref, atol=1e-5, rtol=1e-5), "mismatch vs reference"

    print("KERNEL_OK")
</pallas_src>

<mosaic_0001>
module attributes {stable_mosaic.version = 11 : i64} {
  func.func @snakenet_kernel(%arg0: i32, %arg1: memref<8x32xf32, #tpu.memory_space<vmem>>, %arg2: memref<64x32xf32, #tpu.memory_space<vmem>>, %arg3: memref<1x64xf32, #tpu.memory_space<vmem>>, %arg4: memref<128x64xf32, #tpu.memory_space<vmem>>, %arg5: memref<1x128xf32, #tpu.memory_space<vmem>>, %arg6: memref<8x128xf32, #tpu.memory_space<vmem>>) attributes {dimension_semantics = [#tpu.dimension_semantics<parallel>], iteration_bounds = array<i64: 1>, scalar_prefetch = 0 : i64, scratch_operands = 0 : i64, tpu.core_type = #tpu.core_type<tc>, window_params = [{transform_indices = @transform_0, window_bounds = array<i64: 8, 32>}, {pipeline_mode = #tpu.pipeline_mode<synchronous>, transform_indices = @transform_1, window_bounds = array<i64: 64, 32>}, {pipeline_mode = #tpu.pipeline_mode<synchronous>, transform_indices = @transform_2, window_bounds = array<i64: 1, 64>}, {pipeline_mode = #tpu.pipeline_mode<synchronous>, transform_indices = @transform_3, window_bounds = array<i64: 128, 64>}, {pipeline_mode = #tpu.pipeline_mode<synchronous>, transform_indices = @transform_4, window_bounds = array<i64: 1, 128>}, {transform_indices = @transform_5, window_bounds = array<i64: 8, 128>}]} {
    %c0 = arith.constant 0 : index
    %c0_0 = arith.constant 0 : index
    %0 = vector.load %arg1[%c0, %c0_0] : memref<8x32xf32, #tpu.memory_space<vmem>>, vector<8x32xf32>
    %c0_1 = arith.constant 0 : index
    %c0_2 = arith.constant 0 : index
    %1 = vector.load %arg2[%c0_1, %c0_2] : memref<64x32xf32, #tpu.memory_space<vmem>>, vector<64x32xf32>
    %cst = arith.constant dense<0.000000e+00> : vector<8x64xf32>
    %2 = tpu.matmul %0, %1, %cst {dimension_numbers = #tpu.dot_dimension_numbers<[1], [1], [0], [0], [0, 0, 1, 0], [], []>} : vector<8x32xf32>, vector<64x32xf32>, vector<8x64xf32> -> vector<8x64xf32>
    %c0_3 = arith.constant 0 : index
    %c0_4 = arith.constant 0 : index
    %3 = vector.load %arg3[%c0_3, %c0_4] : memref<1x64xf32, #tpu.memory_space<vmem>>, vector<1x64xf32>
    %4 = vector.broadcast %3 : vector<1x64xf32> to vector<8x64xf32>
    %5 = arith.addf %2, %4 : vector<8x64xf32>
    %cst_5 = arith.constant 0.000000e+00 : f32
    %6 = vector.broadcast %cst_5 : f32 to vector<8x64xf32>
    %7 = arith.maximumf %5, %6 : vector<8x64xf32>
    %c0_6 = arith.constant 0 : index
    %c0_7 = arith.constant 0 : index
    %8 = vector.load %arg4[%c0_6, %c0_7] : memref<128x64xf32, #tpu.memory_space<vmem>>, vector<128x64xf32>
    %cst_8 = arith.constant dense<0.000000e+00> : vector<8x128xf32>
    %9 = tpu.matmul %7, %8, %cst_8 {dimension_numbers = #tpu.dot_dimension_numbers<[1], [1], [0], [0], [0, 0, 1, 0], [], []>} : vector<8x64xf32>, vector<128x64xf32>, vector<8x128xf32> -> vector<8x128xf32>
    %c0_9 = arith.constant 0 : index
    %c0_10 = arith.constant 0 : index
    %10 = vector.load %arg5[%c0_9, %c0_10] : memref<1x128xf32, #tpu.memory_space<vmem>>, vector<1x128xf32>
    %11 = vector.broadcast %10 : vector<1x128xf32> to vector<8x128xf32>
    %12 = arith.addf %9, %11 : vector<8x128xf32>
    %c0_11 = arith.constant 0 : index
    %c0_12 = arith.constant 0 : index
    %13 = vector.load %arg6[%c0_11, %c0_12] : memref<8x128xf32, #tpu.memory_space<vmem>>, vector<8x128xf32>
    tpu.vector_store %arg6[%c0_11, %c0_12], %12 {strides = array<i32>} : memref<8x128xf32, #tpu.memory_space<vmem>>, vector<8x128xf32>,
    return
  }
  func.func @transform_0(%arg0: i32) -> (i32, i32) {
    %c0_i32 = arith.constant 0 : i32
    %c0_i32_0 = arith.constant 0 : i32
    return %arg0, %c0_i32 : i32, i32
  }
  func.func @transform_1(%arg0: i32) -> (i32, i32) {
    %c0_i32 = arith.constant 0 : i32
    %c0_i32_0 = arith.constant 0 : i32
    %c0_i32_1 = arith.constant 0 : i32
    return %c0_i32, %c0_i32_0 : i32, i32
  }
  func.func @transform_2(%arg0: i32) -> (i32, i32) {
    %c0_i32 = arith.constant 0 : i32
    %c0_i32_0 = arith.constant 0 : i32
    %c0_i32_1 = arith.constant 0 : i32
    return %c0_i32, %c0_i32_0 : i32, i32
  }
  func.func @transform_3(%arg0: i32) -> (i32, i32) {
    %c0_i32 = arith.constant 0 : i32
    %c0_i32_0 = arith.constant 0 : i32
    %c0_i32_1 = arith.constant 0 : i32
    return %c0_i32, %c0_i32_0 : i32, i32
  }
  func.func @transform_4(%arg0: i32) -> (i32, i32) {
    %c0_i32 = arith.constant 0 : i32
    %c0_i32_0 = arith.constant 0 : i32
    %c0_i32_1 = arith.constant 0 : i32
    return %c0_i32, %c0_i32_0 : i32, i32
  }
  func.func @transform_5(%arg0: i32) -> (i32, i32) {
    %c0_i32 = arith.constant 0 : i32
    %c0_i32_0 = arith.constant 0 : i32
    return %arg0, %c0_i32 : i32, i32
  }
}

</mosaic_0001>

<bundles_post_ra>
// kernel: tpu_custom_call.1
= control target key start
LH: loop header
LB: loop body
LE: loop exit
PB: predicated region body
PF: predicated region fallthrough
CT: control target
= control target key end

     0   :  { %vm34_vm0 = vcmask 261120   ;;  %vm103_vm1 = vcmask 523264   ;;  %s388_s0 = inlined_call_operand.vmem [shape: f32[8,32], index: 0, kind: input, shape index: {}]   ;;  %s389_s1 = inlined_call_operand.vmem [shape: f32[64,32], index: 1, kind: input, shape index: {}]   ;;  %s390_s2 = inlined_call_operand.vmem [shape: f32[1,64], index: 2, kind: input, shape index: {}]   ;;  %s391_s3 = inlined_call_operand.vmem [shape: f32[128,64], index: 3, kind: input, shape index: {}]   ;;  %s392_s4 = inlined_call_operand.vmem [shape: f32[1,128], index: 4, kind: input, shape index: {}]   ;;  %s393_s5 = inlined_call_operand.hbm [shape: f32[8,128], index: 5, kind: output, shape index: {}]  }
   0x1   :  { %v29_v0 = vld [vmem:[%s389_s1 + $0x38] sm:$0xff]  ;;  %v28_v1 = vld [vmem:[%s389_s1 + $0x30] sm:$0xff]  ;;  %v27_v4 = vld [vmem:[%s389_s1 + $0x28] sm:$0xff] }
   0x2   :  { %192 = vmatpush.xpose.msk.msra.mxu0 %vm34_vm0, %v29_v0  ;;  %v98_v2 = vld [vmem:[%s391_s3 + $0x78] sm:$0xff]  ;;  %v97_v3 = vld [vmem:[%s391_s3 + $0x70] sm:$0xff] }
   0x3   :  { %201 = vmatpush.xpose.msk.msra.mxu1 %vm103_vm1, %v98_v2 }
   0x6   :  { %193 = vmatpush.xpose.msk.msra.mxu0 %vm34_vm0, %v28_v1 }
   0x7   :  { %10 = vsyncpa [#allocation3], 0  ;;  %202 = vmatpush.xpose.msk.msra.mxu1 %vm103_vm1, %v97_v3  ;;  %v96_v5 = vld [vmem:[%s391_s3 + $0x68] sm:$0xff]  ;;  %v26_v6 = vld [vmem:[%s389_s1 + $0x20] sm:$0xff]  ;;  %s247_s20 = smov [#allocation2]  }
   0x8   :  { %v95_v7 = vld [vmem:[%s391_s3 + $0x60] sm:$0xff]  ;;  %v25_v8 = vld [vmem:[%s389_s1 + $0x18] sm:$0xff]  ;;  %v24_v10 = vld [vmem:[%s389_s1 + $0x10] sm:$0xff]  ;;  %s181_s21 = sshll.u32 %s247_s20, 4  ;;  %s182_s21 = int_to_ptr.vmem [resolvable:$true] %s181_s21 }
   0x9   :  { %v94_v9 = vld [vmem:[%s391_s3 + $0x58] sm:$0xff]  ;;  %v93_v11 = vld [vmem:[%s391_s3 + $0x50] sm:$0xff]  ;;  %v23_v12 = vld [vmem:[%s389_s1 + $0x8] sm:$0xff] }
   0xa   :  { %194 = vmatpush.xpose.msk.msra.mxu0 %vm34_vm0, %v27_v4  ;;  %v92_v13 = vld [vmem:[%s391_s3 + $0x48] sm:$0xff]  ;;  %v22_v14 = vld [vmem:[%s389_s1] sm:$0xff]  ;;  %v90_v17 = vld [vmem:[%s391_s3 + $0x38] sm:$0xff] }
   0xb   :  { %203 = vmatpush.xpose.msk.msra.mxu1 %vm103_vm1, %v96_v5  ;;  %v21_v15 = vld [vmem:[%s388_s0] sm:$0xff]  ;;  %v89_v18 = vld [vmem:[%s391_s3 + $0x30] sm:$0xff]  ;;  %v88_v19 = vld [vmem:[%s391_s3 + $0x28] sm:$0xff] }
   0xc   :  { %v91_v16 = vld [vmem:[%s391_s3 + $0x40] sm:$0xff]  ;;  %v86_v21 = vld [vmem:[%s391_s3 + $0x18] sm:$0xff]  ;;  %v85_v22 = vld [vmem:[%s391_s3 + $0x10] sm:$0xff] }
   0xd   :  { %v87_v20 = vld [vmem:[%s391_s3 + $0x20] sm:$0xff]  ;;  %v84_v23 = vld [vmem:[%s391_s3 + $0x8] sm:$0xff] }
   0xe   :  { %195 = vmatpush.xpose.msk.msra.mxu0 %vm34_vm0, %v26_v6  ;;  %v83_v24 = vld [vmem:[%s391_s3] sm:$0xff]  ;;  %s183_s3 = sshll.u32 %s393_s5, 4  ;;  %s184_s3 = int_to_ptr.hbm [resolvable:$true] %s183_s3 }
   0xf   :  { %204 = vmatpush.xpose.msk.msra.mxu1 %vm103_vm1, %v95_v7  ;;  %v219_v25 = vld [vmem:[%s390_s2] ss:$0 sm:$0xff] }
  0x10   :  { %v220_v29 = vld [vmem:[%s392_s4] ss:$0 sm:$0xff] }
  0x12   :  { %196 = vmatpush.xpose.msk.msra.mxu0 %vm34_vm0, %v25_v8 }
  0x13   :  { %205 = vmatpush.xpose.msk.msra.mxu1 %vm103_vm1, %v94_v9 }
  0x16   :  { %197 = vmatpush.xpose.msk.msra.mxu0 %vm34_vm0, %v24_v10 }
  0x17   :  { %206 = vmatpush.xpose.msk.msra.mxu1 %vm103_vm1, %v93_v11 }
  0x1a   :  { %198 = vmatpush.xpose.msk.msra.mxu0 %vm34_vm0, %v23_v12 }
  0x1b   :  { %207 = vmatpush.xpose.msk.msra.mxu1 %vm103_vm1, %v92_v13 }
  0x1e   :  { %199 = vmatpush.xpose.msk.msra.mxu0 %vm34_vm0, %v22_v14 }
  0x1f   :  { %208 = vmatpush.xpose.msk.msra.mxu1 %vm103_vm1, %v91_v16 }
  0x21   :  { %200 = vmatmul.msk.f32.vlgmr.msra.gmra.mxu0 %vm34_vm0, %v21_v15 }
  0x23   :  { %209 = vmatpush.xpose.msk.msra.mxu1 %vm103_vm1, %v90_v17 }
  0x27   :  { %210 = vmatpush.xpose.msk.msra.mxu1 %vm103_vm1, %v89_v18 }
  0x2b   :  { %211 = vmatpush.xpose.msk.msra.mxu1 %vm103_vm1, %v88_v19 }
  0x2f   :  { %212 = vmatpush.xpose.msk.msra.mxu1 %vm103_vm1, %v87_v20 }
  0x33   :  { %213 = vmatpush.xpose.msk.msra.mxu1 %vm103_vm1, %v86_v21 }
  0x37   :  { %214 = vmatpush.xpose.msk.msra.mxu1 %vm103_vm1, %v85_v22 }
  0x3b   :  { %215 = vmatpush.xpose.msk.msra.mxu1 %vm103_vm1, %v84_v23 }
  0x3f   :  { %216 = vmatpush.xpose.msk.msra.mxu1 %vm103_vm1, %v83_v24 }
  0x9e   :  { %v79_v26 = vpop.f32.mrf.mxu0 }
  0x9f   :  { %v80_v27 = vadd.f32 %v219_v25, %v79_v26 }
  0xa1   :  { %v82_v28 = vmax.f32 %v80_v27, 0.0 }
  0xa3   :  { %217 = vmatmul.msk.f32.vlgmr.msra.gmra.mxu1 %vm103_vm1, %v82_v28 }
 0x120   :  { %v172_v30 = vpop.f32.mrf.mxu1 }
 0x121   :  { %v173_v31 = vadd.f32 %v220_v29, %v172_v30 }
 0x123   :  { %175 = vst [vmem:[#allocation2] sm:$0xff] %v173_v31 }
 0x124   :  { %186 = dma.vmem_to_hbm [thread:$0]  %s182_s21, 128, %s184_s3, [#allocation3]  }
 0x125   :  { %245 = dma.done.wait [#allocation3], 128  }
 0x126   :  { %246 = vsyncadd [#allocation3], 4294967168 }
 0x127   :  { %191 = vsyncpa [#allocation3], 1 }

</bundles_post_ra>
